<compile_context>
chip_gen: v6e
topology: v6e:2x2x1
jax: 0.10.0
libtpu: 0.0.40
codegen_flags: <defaults>
</compile_context>

<pallas_src>
import math

import jax
import jax.numpy as jnp
from jax.experimental import pallas as pl
from jax.experimental.pallas import tpu as pltpu


# ----------------------------------------------------------------------------
# Kernel
# ----------------------------------------------------------------------------

def _layernorm_kernel(x_ref, g_ref, b_ref, o_ref):
    """WithBias LayerNorm over the last (channel) dim of a (TILE_R, C) row tile."""
    x = x_ref[...].astype(jnp.float32)                    # stats in f32
    mu = jnp.mean(x, axis=-1, keepdims=True)
    xc = x - mu
    var = jnp.mean(xc * xc, axis=-1, keepdims=True)       # unbiased=False
    inv = jax.lax.rsqrt(var + 1e-5)                       # EUP rsqrt (own VLIW slot)
    xn = (xc * inv).astype(o_ref.dtype)                   # normalize in f32 ...
    y = xn * g_ref[...] + b_ref[...]                      # ... scale/shift in act dtype
    o_ref[...] = y.astype(o_ref.dtype)


# ----------------------------------------------------------------------------
# Wrapper
# ----------------------------------------------------------------------------

def withbias_layernorm(x, weight, bias, *,
                       tile_bytes_budget=4 * 1024 * 1024,
                       min_grid_steps=8):
    """LayerNorm over the last dim of `x` (any rank), matching WithBias_LayerNorm.

    Note: weight/bias are cast to x.dtype (matches the PyTorch module when
    parameters and activations share dtype, which is the case in practice).
    """
    orig_shape = x.shape
    C = orig_shape[-1]
    R = int(math.prod(orig_shape[:-1])) if len(orig_shape) > 1 else 1
    x2 = x.reshape(R, C)

    itemsize = jnp.dtype(x.dtype).itemsize
    sub = max(8, 32 // itemsize)          # sublane packing: 8 f32 / 16 bf16 / 32 int8
    row_bytes = C * itemsize

    # Clamp per-block budget so 2x(in) + 2x(out) double-buffered blocks stay
    # comfortably inside v7x's 64 MiB-per-TC VMEM (128 MiB on v5e/v6e).
    tile_bytes_budget = min(tile_bytes_budget, 8 * 1024 * 1024)

    if R <= sub:
        tile = R                                           # tiny input: full extent
    else:
        # Rows that fit the byte budget (a few MiB amortizes the ~0.35us/step
        # overhead to ~85-90% of HBM roofline).
        budget_rows = max(sub, (tile_bytes_budget // row_bytes) // sub * sub)
        # Guarantee a multi-step grid: >=2 steps feeds both v7x TensorCores,
        # >=4-8 steps gives the software pipeline something to overlap.
        cap_rows = max(sub, (pl.cdiv(R, min_grid_steps) // sub) * sub)
        tile = min(budget_rows, cap_rows)

    num_tiles = pl.cdiv(R, tile)           # ragged edge block is masked on writeback

    w2 = weight.reshape(1, C).astype(x.dtype)
    b2 = bias.reshape(1, C).astype(x.dtype)

    block_bytes = tile * C * itemsize
    # Cover 2x-in + 2x-out double-buffered blocks plus headroom; cap at 48 MiB
    # so it is valid even against v7x's 64 MiB-per-TC physical VMEM.
    vmem_limit = int(min(48 * 1024 * 1024,
                         max(32 * 1024 * 1024, 4 * block_bytes + 4 * 1024 * 1024)))

    cost = pl.CostEstimate(
        flops=7 * R * C,
        transcendentals=R,
        bytes_accessed=2 * R * C * itemsize + 2 * C * itemsize,
    )

    out = pl.pallas_call(
        _layernorm_kernel,
        out_shape=jax.ShapeDtypeStruct((R, C), x.dtype),
        grid=(num_tiles,),
        in_specs=[
            pl.BlockSpec((tile, C), lambda i: (i, 0)),     # streamed row tiles
            pl.BlockSpec((1, C), lambda i: (0, 0)),        # weight: VMEM-resident
            pl.BlockSpec((1, C), lambda i: (0, 0)),        # bias:   VMEM-resident
        ],
        out_specs=pl.BlockSpec((tile, C), lambda i: (i, 0)),
        compiler_params=pltpu.CompilerParams(
            dimension_semantics=("parallel",),             # shard tiles over TCs (v7x)
            vmem_limit_bytes=vmem_limit),
        cost_estimate=cost,
    )(x2, w2, b2)

    return out.reshape(orig_shape)


# ----------------------------------------------------------------------------
# Demo / self-check
# ----------------------------------------------------------------------------

if __name__ == "__main__":
    # Shapes as used inside ZeroIIformer: x is to_3d(feature) = (B, H*W, C).
    B, HW, C = 2, 64, 48
    key = jax.random.PRNGKey(0)
    kx, kw, kb = jax.random.split(key, 3)
    x = jax.random.normal(kx, (B, HW, C), jnp.float32)
    weight = jnp.ones((C,), jnp.float32) + 0.01 * jax.random.normal(kw, (C,), jnp.float32)
    bias = 0.01 * jax.random.normal(kb, (C,), jnp.float32)

    fn = jax.jit(withbias_layernorm)
    out = jax.block_until_ready(fn(x, weight, bias))

    # Pure-JAX reference (matches the PyTorch forward exactly).
    def ref_ln(xv, w, b):
        mu = jnp.mean(xv, axis=-1, keepdims=True)
        var = jnp.mean((xv - mu) ** 2, axis=-1, keepdims=True)
        return (xv - mu) / jnp.sqrt(var + 1e-5) * w + b

    ref = ref_ln(x, weight, bias)
    assert out.shape == x.shape
    assert bool(jnp.all(jnp.isfinite(out)))
    assert jnp.allclose(out, ref, atol=1e-4, rtol=1e-4)

    # Ragged row count (R not a multiple of the tile): exercises the padless
    # edge-block path introduced in this version.
    x_ragged = jax.random.normal(jax.random.PRNGKey(1), (2, 60, C), jnp.float32)
    out_ragged = jax.block_until_ready(fn(x_ragged, weight, bias))
    assert jnp.allclose(out_ragged, ref_ln(x_ragged, weight, bias),
                        atol=1e-4, rtol=1e-4)

    print("KERNEL_OK")
</pallas_src>

<mosaic_0001>
module attributes {stable_mosaic.version = 11 : i64} {
  func.func @_layernorm_kernel(%arg0: i32, %arg1: memref<16x48xf32, #tpu.memory_space<vmem>>, %arg2: memref<1x48xf32, #tpu.memory_space<vmem>>, %arg3: memref<1x48xf32, #tpu.memory_space<vmem>>, %arg4: memref<16x48xf32, #tpu.memory_space<vmem>>) attributes {dimension_semantics = [#tpu.dimension_semantics<parallel>], iteration_bounds = array<i64: 8>, scalar_prefetch = 0 : i64, scratch_operands = 0 : i64, tpu.core_type = #tpu.core_type<tc>, window_params = [{transform_indices = @transform_0, window_bounds = array<i64: 16, 48>}, {pipeline_mode = #tpu.pipeline_mode<synchronous>, transform_indices = @transform_1, window_bounds = array<i64: 1, 48>}, {pipeline_mode = #tpu.pipeline_mode<synchronous>, transform_indices = @transform_2, window_bounds = array<i64: 1, 48>}, {transform_indices = @transform_3, window_bounds = array<i64: 16, 48>}]} {
    %c0 = arith.constant 0 : index
    %c0_0 = arith.constant 0 : index
    %0 = vector.load %arg1[%c0, %c0_0] : memref<16x48xf32, #tpu.memory_space<vmem>>, vector<16x48xf32>
    %cst = arith.constant dense<0.000000e+00> : vector<16xf32>
    %1 = vector.multi_reduction <add>, %0, %cst [1] : vector<16x48xf32> to vector<16xf32>
    %2 = vector.shape_cast %1 : vector<16xf32> to vector<16x1xf32>
    %cst_1 = arith.constant 4.800000e+01 : f32
    %3 = vector.broadcast %cst_1 : f32 to vector<16x1xf32>
    %4 = arith.divf %2, %3 : vector<16x1xf32>
    %5 = vector.broadcast %4 : vector<16x1xf32> to vector<16x48xf32>
    %6 = arith.subf %0, %5 : vector<16x48xf32>
    %7 = arith.mulf %6, %6 : vector<16x48xf32>
    %cst_2 = arith.constant dense<0.000000e+00> : vector<16xf32>
    %8 = vector.multi_reduction <add>, %7, %cst_2 [1] : vector<16x48xf32> to vector<16xf32>
    %9 = vector.shape_cast %8 : vector<16xf32> to vector<16x1xf32>
    %cst_3 = arith.constant 4.800000e+01 : f32
    %10 = vector.broadcast %cst_3 : f32 to vector<16x1xf32>
    %11 = arith.divf %9, %10 : vector<16x1xf32>
    %cst_4 = arith.constant 9.99999974E-6 : f32
    %12 = vector.broadcast %cst_4 : f32 to vector<16x1xf32>
    %13 = arith.addf %11, %12 : vector<16x1xf32>
    %14 = math.rsqrt %13 : vector<16x1xf32>
    %15 = vector.broadcast %14 : vector<16x1xf32> to vector<16x48xf32>
    %16 = arith.mulf %6, %15 : vector<16x48xf32>
    %c0_5 = arith.constant 0 : index
    %c0_6 = arith.constant 0 : index
    %17 = vector.load %arg2[%c0_5, %c0_6] : memref<1x48xf32, #tpu.memory_space<vmem>>, vector<1x48xf32>
    %18 = vector.broadcast %17 : vector<1x48xf32> to vector<16x48xf32>
    %19 = arith.mulf %16, %18 : vector<16x48xf32>
    %c0_7 = arith.constant 0 : index
    %c0_8 = arith.constant 0 : index
    %20 = vector.load %arg3[%c0_7, %c0_8] : memref<1x48xf32, #tpu.memory_space<vmem>>, vector<1x48xf32>
    %21 = vector.broadcast %20 : vector<1x48xf32> to vector<16x48xf32>
    %22 = arith.addf %19, %21 : vector<16x48xf32>
    %c0_9 = arith.constant 0 : index
    %c0_10 = arith.constant 0 : index
    %23 = vector.load %arg4[%c0_9, %c0_10] : memref<16x48xf32, #tpu.memory_space<vmem>>, vector<16x48xf32>
    tpu.vector_store %arg4[%c0_9, %c0_10], %22 {strides = array<i32>} : memref<16x48xf32, #tpu.memory_space<vmem>>, vector<16x48xf32>,
    return
  }
  func.func @transform_0(%arg0: i32) -> (i32, i32) {
    %c0_i32 = arith.constant 0 : i32
    %c0_i32_0 = arith.constant 0 : i32
    return %arg0, %c0_i32 : i32, i32
  }
  func.func @transform_1(%arg0: i32) -> (i32, i32) {
    %c0_i32 = arith.constant 0 : i32
    %c0_i32_0 = arith.constant 0 : i32
    %c0_i32_1 = arith.constant 0 : i32
    return %c0_i32, %c0_i32_0 : i32, i32
  }
  func.func @transform_2(%arg0: i32) -> (i32, i32) {
    %c0_i32 = arith.constant 0 : i32
    %c0_i32_0 = arith.constant 0 : i32
    %c0_i32_1 = arith.constant 0 : i32
    return %c0_i32, %c0_i32_0 : i32, i32
  }
  func.func @transform_3(%arg0: i32) -> (i32, i32) {
    %c0_i32 = arith.constant 0 : i32
    %c0_i32_0 = arith.constant 0 : i32
    return %arg0, %c0_i32 : i32, i32
  }
}

</mosaic_0001>

<bundles_post_ra>
// kernel: withbias_layernorm.1
= control target key start
LH: loop header
LB: loop body
LE: loop exit
PB: predicated region body
PF: predicated region fallthrough
CT: control target
= control target key end

     0   :  { %s333_s12 = smov 0   ;;  %s369_s0 = inlined_call_operand.vmem [shape: f32[128,48], index: 0, kind: input, shape index: {}]   ;;  %s370_s1 = inlined_call_operand.vmem [shape: f32[1,48], index: 1, kind: input, shape index: {}]   ;;  %s371_s2 = inlined_call_operand.vmem [shape: f32[1,48], index: 2, kind: input, shape index: {}]   ;;  %s372_s3 = inlined_call_operand.vmem [shape: f32[128,48], index: 3, kind: output, shape index: {}]  }
   0x1 LB: > { %s280_s13 = sadd.s32 4294967295, %s311_s12   ;;  %p284_p0 = scmp.ge.s32.totalorder %s311_s12, 1  ;;  %s311_s12 = sphi %s333_s12, %s13_s12  }
   0x2   : > { %p138_p1 = scmp.lt.s32.totalorder %s311_s12, 9 }
   0x4   : > { %p139_p2 = pnand %p284_p0, %p138_p1 }
   0x5   : > { %s285_s14 = sshll.u32 (!%p139_p2), %s280_s13, 1 }
   0x6   : > { %142 = sbr.rel (%p139_p2) target bundleno = 328 (0x148), region = 32  ;;  %p163_p3 = scmp.lt.s32.totalorder (!%p139_p2), %s285_s14, 15 }
   0xb   : > { %s374_s14 = smov (!%p163_p3, %s285_s14), 15  ;;  %vm176_vm0 = vcmask 392192   ;;  %v289_v21 = vld [vmem:[%s370_s1] ss:$0 sm:$0xff] }
   0xc   : > { %s286_s15 = sshll.u32 %s374_s14, 3  ;;  %v290_v23 = vld [vmem:[%s371_s2] ss:$0 sm:$0xff] }
   0xd   : > { %s166_s18 = scalar_lea.vmem %s369_s0, %s286_s15  ;;  %s172_s25 = scalar_lea.vmem %s372_s3, %s286_s15 }
   0xe   : > { %v174_v0 = vld [vmem:[%s166_s18] sm:$0xff]  ;;  %v175_v1 = vld [vmem:[%s166_s18 + $0x8] sm:$0xff] }
   0xf   : > { %v177_v2 = vsel %vm176_vm0, %v174_v0, 0.0  ;;  %v180_v3 = vsel %vm176_vm0, %v175_v1, 0.0 }
  0x10   : > { %178 = vadd.xlane.f32.xlu0 %v177_v2 }
  0x14   : > { %181 = vadd.xlane.f32.xlu0 %v180_v3 }
  0x99   : > { %v179_v4 = vpop.xlane.xlu0 %178 }
  0x9a   : > { %v184_v5 = vmul.f32 0.020833334, %v179_v4 }
  0x9c   : > { %v186_v6 = vsub.f32 %v174_v0, %v184_v5 }
  0x9d   : > { %v182_v7 = vpop.xlane.xlu0 %181 }
  0x9e   : > { %v185_v8 = vmul.f32 0.020833334, %v182_v7  ;;  %v188_v9 = vmul.f32 %v186_v6, %v186_v6 }
  0xa0   : > { %v187_v10 = vsub.f32 %v175_v1, %v185_v8  ;;  %v190_v11 = vsel %vm176_vm0, %v188_v9, 0.0 }
  0xa1   : > { %191 = vadd.xlane.f32.xlu1 %v190_v11 }
  0xa2   : > { %v189_v12 = vmul.f32 %v187_v10, %v187_v10 }
  0xa4   : > { %v193_v13 = vsel %vm176_vm0, %v189_v12, 0.0 }
  0xa5   : > { %194 = vadd.xlane.f32.xlu1 %v193_v13 }
 0x12a   : > { %v192_v14 = vpop.xlane.xlu1 %191 }
 0x12b   : > { %v196_v15 = vmul.f32 0.020833334, %v192_v14 }
 0x12d   : > { %v198_v16 = vadd.f32 1e-05, %v196_v15 }
 0x12e   : > { %v195_v17 = vpop.xlane.xlu1 %194 }
 0x12f   : > { %301 = vrsqrt.f32 %v198_v16  ;;  %v197_v18 = vmul.f32 0.020833334, %v195_v17 }
 0x131   : > { %v199_v19 = vadd.f32 1e-05, %v197_v18 }
 0x133   : > { %303 = vrsqrt.f32 %v199_v19 }
 0x13c   : > { %v302_v20 = vpop.eup %301 }
 0x13d   : > { %v202_v22 = vmul.f32 %v302_v20, %v186_v6 }
 0x13f   : > { %v211_v24 = vmul.f32 %v289_v21, %v202_v22 }
 0x140   : > { %v304_v25 = vpop.eup %303 }
 0x141   : > { %v220_v26 = vadd.f32 %v290_v23, %v211_v24  ;;  %v203_v27 = vmul.f32 %v304_v25, %v187_v10 }
 0x143   : > { %222 = vst.msk [vmem:[%s172_s25] sm:$0xff] %vm176_vm0, %v220_v26  ;;  %v212_v28 = vmul.f32 %v289_v21, %v203_v27 }
 0x145   : > { %v221_v29 = vadd.f32 %v290_v23, %v212_v28 }
 0x147   : > { %223 = vst.msk [vmem:[%s172_s25 + $0x8] sm:$0xff] %vm176_vm0, %v221_v29 }
 0x148 PF: > { %s13_s12 = sadd.s32 1, %s311_s12  }
 0x149   : > { %p10_p4 = scmp.ge.s32.totalorder %s13_s12, 10  }
 0x14b   :  { %12 = sbr.rel (!%p10_p4) target bundleno = 1 (0x1), region = 62 }

</bundles_post_ra>
